<compile_context>
chip_gen: v6e
topology: v6e:2x2x1
jax: 0.10.0
libtpu: 0.0.40
codegen_flags: <defaults>
</compile_context>

<pallas_src>
import functools
from typing import NamedTuple

import jax
import jax.numpy as jnp
from jax.experimental import pallas as pl
from jax.experimental.pallas import tpu as pltpu


def _round_up(x: int, m: int) -> int:
    return ((x + m - 1) // m) * m


# Exceptions that mean "this pipeline hint / API variant is not supported by the
# installed jax".  Narrow on purpose: a genuine kernel bug re-raises from the
# plain-spec retry, so nothing is silently swallowed.
_FALLBACK_ERRORS = (TypeError, ValueError, NotImplementedError, AttributeError)
_lowering_exc = getattr(pltpu, "LoweringException", None)
if isinstance(_lowering_exc, type) and issubclass(_lowering_exc, Exception):
    _FALLBACK_ERRORS = _FALLBACK_ERRORS + (_lowering_exc,)

_HAS_BUFFERED = hasattr(pl, "Buffered")


def _buffered_spec(block_shape, index_map, buffer_count):
    """BlockSpec with a pipeline-depth hint; plain BlockSpec if unsupported."""
    if _HAS_BUFFERED:
        try:
            return pl.BlockSpec(block_shape, index_map,
                                pipeline_mode=pl.Buffered(buffer_count))
        except (TypeError, ValueError):
            pass
    return pl.BlockSpec(block_shape, index_map)


def _vmem_capacity_bytes() -> int:
    """Per-core VMEM capacity (generation-aware), with a conservative fallback."""
    try:
        cap = int(pltpu.get_tpu_info().vmem_capacity_bytes)
    except Exception:                       # info query unavailable
        cap = 64 * 1024 * 1024              # conservative: v7x per-TensorCore VMEM
    return max(32 << 20, min(cap, 128 << 20))


# ----------------------------------------------------------------------------
# One-time weight fusion (hoisted out of the forward path).
# ----------------------------------------------------------------------------
class FusedKVWeights(NamedTuple):
    """Pre-fused projection weights: build once at init, reuse every forward."""
    w: jax.Array            # [H, nk_pad + nv_pad]
    hidden_size: int
    nk: int
    nv: int
    nk_pad: int
    nv_pad: int


def fuse_kv_weights(w_key, w_value, dtype=None) -> FusedKVWeights:
    """Fuse the K and V projection weights once.

    w_key:   [H, Nk]   (== PyTorch `key.weight.T`)
    w_value: [H, Nv]   (== PyTorch `value.weight.T`)
    """
    h, nk = w_key.shape
    h2, nv = w_value.shape
    if h != h2:
        raise ValueError("w_key and w_value must share the hidden dimension")
    dtype = jnp.dtype(dtype) if dtype is not None else w_key.dtype
    nk_pad = _round_up(nk, 128)
    nv_pad = _round_up(nv, 128)
    wk = w_key.astype(dtype)
    wv = w_value.astype(dtype)
    if nk_pad != nk:
        wk = jnp.pad(wk, ((0, 0), (0, nk_pad - nk)))
    if nv_pad != nv:
        wv = jnp.pad(wv, ((0, 0), (0, nv_pad - nv)))
    w = jnp.concatenate([wk, wv], axis=1)
    return FusedKVWeights(w=w, hidden_size=h, nk=nk, nv=nv,
                          nk_pad=nk_pad, nv_pad=nv_pad)


# ----------------------------------------------------------------------------
# Tile planning.
# ----------------------------------------------------------------------------
class _Plan(NamedTuple):
    mode: str               # "resident" | "cols" | "ktiled"
    tm: int
    tn: int
    tk: int
    footprint: int


def _choose_plan(m, h, n_pad, itemsize, mult, tm_req, budget) -> _Plan:
    """Pick tile sizes so the working set fits `budget` bytes of VMEM."""
    tm0 = min(_round_up(max(tm_req, mult), mult), _round_up(max(m, 1), mult))

    # ---- Plan A: whole fused weight resident in VMEM. ------------------------
    # Counted once when single-buffering (pl.Buffered(1)) is available, twice
    # otherwise (default double-buffering).
    w_copies = 1 if _HAS_BUFFERED else 2

    def fp_res(tm_):
        return itemsize * (w_copies * h * n_pad + 2 * tm_ * h + 2 * tm_ * n_pad)

    tm_ = tm0
    while fp_res(tm_) > budget and tm_ > mult:
        tm_ = max(mult, _round_up(tm_ // 2, mult))
    if fp_res(tm_) <= budget:
        # Plenty of VMEM (v5e/v6e): grow the row tile up to 512 to amortize
        # per-grid-step overhead.
        while tm_ < 512 and tm_ < _round_up(m, mult):
            nxt = min(512, 2 * tm_, _round_up(m, mult))
            if nxt == tm_ or fp_res(nxt) > budget:
                break
            tm_ = nxt
        return _Plan("resident", tm_, n_pad, h, fp_res(tm_))

    # ---- Plan B: column-tiled weight, column axis outermost. -----------------
    # Weight tile double-buffered, x streamed with a 3-deep pipeline, output
    # double-buffered.  Maximize tn (x re-stream traffic ~ 1/tn); prefer the
    # largest tm that still reaches tn >= 512 (floor 256 = full MXU width on
    # v6e/v7x).
    def tn_max_for(tm_):
        avail = budget - 3 * tm_ * h * itemsize
        if avail <= 0:
            return 0
        return (avail // ((2 * h + 2 * tm_) * itemsize)) // 256 * 256

    tn_cap = _round_up(n_pad, 256)
    best = None
    tm_ = tm0
    while True:
        tn_ = min(tn_max_for(tm_), tn_cap)
        if tn_ >= 512:
            best = (tm_, tn_)
            break
        if tn_ >= 256 and best is None:
            best = (tm_, tn_)
        if tm_ <= mult:
            break
        tm_ = max(mult, _round_up(tm_ // 2, mult))
    if best is not None:
        tm_, tn_ = best
        fp = itemsize * (2 * h * tn_ + 3 * tm_ * h + 2 * tm_ * tn_)
        return _Plan("cols", tm_, tn_, h, fp)

    # ---- Plan C: additionally tile the hidden (reduction) axis. --------------
    tn_ = 256 if n_pad >= 256 else _round_up(n_pad, 128)
    tk_cands = [c for c in (1024, 512, 256, 128) if c <= _round_up(h, 128)]
    # Prefer tk that divides H (no ragged-K masking needed).
    tk_cands = ([c for c in tk_cands if h % c == 0]
                + [c for c in tk_cands if h % c != 0]) or [128]

    def fp_k(tm_, tk_):
        return itemsize * (2 * tk_ * tn_ + 2 * tm_ * tk_ + 2 * tm_ * tn_) \
            + 4 * tm_ * tn_                           # f32 accumulator scratch

    tm_ = tm0
    while True:
        for tk_ in tk_cands:
            if fp_k(tm_, tk_) <= budget:
                return _Plan("ktiled", tm_, tn_, tk_, fp_k(tm_, tk_))
        if tm_ <= mult:
            break
        tm_ = max(mult, _round_up(tm_ // 2, mult))
    # Nothing fits the (conservative) budget: smallest K-tiled plan; the raised
    # vmem_limit headroom absorbs it.
    tk_ = min(tk_cands)
    return _Plan("ktiled", mult, tn_, tk_, fp_k(mult, tk_))


# ----------------------------------------------------------------------------
# Kernels.
# ----------------------------------------------------------------------------
def _kv_resident_kernel(x_ref, w_ref, k_ref, v_ref, *, nk_pad):
    # x_ref: (tm, H)   w_ref: (H, nk_pad + nv_pad)
    # k_ref: (tm, nk_pad)   v_ref: (tm, nv_pad)
    x = x_ref[...]
    k_ref[...] = jnp.dot(x, w_ref[:, :nk_pad],
                         preferred_element_type=jnp.float32).astype(k_ref.dtype)
    v_ref[...] = jnp.dot(x, w_ref[:, nk_pad:],
                         preferred_element_type=jnp.float32).astype(v_ref.dtype)


def _kv_cols_kernel(x_ref, w_ref, o_ref):
    # x_ref: (tm, H)   w_ref: (H, tn)   o_ref: (tm, tn)
    o_ref[...] = jnp.dot(x_ref[...], w_ref[...],
                         preferred_element_type=jnp.float32).astype(o_ref.dtype)


def _kv_ktiled_kernel(x_ref, w_ref, o_ref, acc_ref, *, hidden, tk):
    # x_ref: (tm, tk)   w_ref: (tk, tn)   o_ref: (tm, tn)   acc_ref: (tm, tn) f32
    ki = pl.program_id(2)

    @pl.when(ki == 0)
    def _init():
        acc_ref[...] = jnp.zeros_like(acc_ref)

    x = x_ref[...]
    if hidden % tk != 0:
        # Zero the ragged tail of the hidden axis so out-of-bounds garbage in
        # the final reduction block contributes nothing.
        col = ki * tk + jax.lax.broadcasted_iota(jnp.int32, (1, tk), 1)
        x = jnp.where(col < hidden, x, jnp.zeros((), x.dtype))
    acc_ref[...] += jnp.dot(x, w_ref[...], preferred_element_type=jnp.float32)

    @pl.when(ki == pl.num_programs(2) - 1)
    def _finalize():
        o_ref[...] = acc_ref[...].astype(o_ref.dtype)


# ----------------------------------------------------------------------------
# Plan runners.
# ----------------------------------------------------------------------------
def _run_resident(x2d, weights, plan, vmem_limit):
    m, h = x2d.shape
    tm = plan.tm
    n_pad = weights.nk_pad + weights.nv_pad
    kernel = functools.partial(_kv_resident_kernel, nk_pad=weights.nk_pad)

    def call(w_spec):
        return pl.pallas_call(
            kernel,
            out_shape=(jax.ShapeDtypeStruct((m, weights.nk_pad), x2d.dtype),
                       jax.ShapeDtypeStruct((m, weights.nv_pad), x2d.dtype)),
            grid=(pl.cdiv(m, tm),),
            in_specs=[pl.BlockSpec((tm, h), lambda i: (i, 0)), w_spec],
            out_specs=(pl.BlockSpec((tm, weights.nk_pad), lambda i: (i, 0)),
                       pl.BlockSpec((tm, weights.nv_pad), lambda i: (i, 0))),
            compiler_params=pltpu.CompilerParams(
                dimension_semantics=("parallel",),
                vmem_limit_bytes=vmem_limit),
        )(x2d, weights.w)

    try:
        # Constant index_map => the weight is fetched once; single-buffering it
        # reclaims the second VMEM copy (matches _choose_plan's accounting).
        return call(_buffered_spec((h, n_pad), lambda i: (0, 0), 1))
    except _FALLBACK_ERRORS:
        return call(pl.BlockSpec((h, n_pad), lambda i: (0, 0)))


def _run_cols(x2d, weights, plan, vmem_limit):
    m, h = x2d.shape
    tm, tn = plan.tm, plan.tn
    n_pad = weights.nk_pad + weights.nv_pad

    def call(x_spec):
        return pl.pallas_call(
            _kv_cols_kernel,
            out_shape=jax.ShapeDtypeStruct((m, n_pad), x2d.dtype),
            # Column axis OUTER: the weight block index is constant across the
            # inner row sweep, so each weight tile is fetched once and only x is
            # re-streamed (traffic ~ M*H*N/tn instead of ~M*H*N/tm).
            grid=(pl.cdiv(n_pad, tn), pl.cdiv(m, tm)),
            in_specs=[x_spec, pl.BlockSpec((h, tn), lambda j, i: (0, j))],
            out_specs=pl.BlockSpec((tm, tn), lambda j, i: (i, j)),
            compiler_params=pltpu.CompilerParams(
                dimension_semantics=("parallel", "parallel"),
                vmem_limit_bytes=vmem_limit),
        )(x2d, weights.w)

    try:
        # x is the streamed operand; a 3-deep pipeline hides DMA-start latency
        # behind the short per-step compute (mainly helps v7x's fast HBM).
        return call(_buffered_spec((tm, h), lambda j, i: (i, 0), 3))
    except _FALLBACK_ERRORS:
        return call(pl.BlockSpec((tm, h), lambda j, i: (i, 0)))


def _run_ktiled(x2d, weights, plan, vmem_limit):
    m, h = x2d.shape
    tm, tn, tk = plan.tm, plan.tn, plan.tk
    n_pad = weights.nk_pad + weights.nv_pad
    kernel = functools.partial(_kv_ktiled_kernel, hidden=h, tk=tk)
    return pl.pallas_call(
        kernel,
        out_shape=jax.ShapeDtypeStruct((m, n_pad), x2d.dtype),
        grid=(pl.cdiv(n_pad, tn), pl.cdiv(m, tm), pl.cdiv(h, tk)),
        in_specs=[pl.BlockSpec((tm, tk), lambda j, i, k: (i, k)),
                  pl.BlockSpec((tk, tn), lambda j, i, k: (k, j))],
        out_specs=pl.BlockSpec((tm, tn), lambda j, i, k: (i, j)),
        scratch_shapes=[pltpu.VMEM((tm, tn), jnp.float32)],
        compiler_params=pltpu.CompilerParams(
            dimension_semantics=("parallel", "parallel", "arbitrary"),
            vmem_limit_bytes=vmem_limit),
    )(x2d, weights.w)


# ----------------------------------------------------------------------------
# Public forward.
# ----------------------------------------------------------------------------
def linear_key_value(x, weights: FusedKVWeights, *, tm=256, vmem_budget_bytes=None):
    """Fused K/V projection: returns (k, v) = (x @ Wk, x @ Wv).

    x: [..., H].  `weights` must come from `fuse_kv_weights` (built once).
    """
    if x.shape[-1] != weights.hidden_size:
        raise ValueError("x hidden dim does not match the fused weights")
    lead = x.shape[:-1]
    h = weights.hidden_size
    m = 1
    for d in lead:
        m *= int(d)

    x2d = x.reshape(m, h)
    if x2d.dtype != weights.w.dtype:
        # Compute in the dtype the weights were fused for (bf16 MXU path etc.).
        x2d = x2d.astype(weights.w.dtype)

    n_pad = weights.nk_pad + weights.nv_pad
    itemsize = jnp.dtype(x2d.dtype).itemsize
    mult = max(8, 32 // itemsize)            # sublane packing of the row tiles

    cap = _vmem_capacity_bytes()
    budget = int(vmem_budget_bytes) if vmem_budget_bytes is not None else int(cap * 0.80)
    vmem_limit = int(max(32 << 20, min(budget + (8 << 20), cap - (2 << 20))))

    plan = _choose_plan(m, h, n_pad, itemsize, mult, tm, budget)

    if plan.mode == "resident":
        k2d, v2d = _run_resident(x2d, weights, plan, vmem_limit)
    else:
        if plan.mode == "cols":
            fused = _run_cols(x2d, weights, plan, vmem_limit)
        else:
            fused = _run_ktiled(x2d, weights, plan, vmem_limit)
        # TODO(synk): the non-resident paths still pay one post-kernel column
        # split of the fused output; splitting in-kernel there would need
        # per-output column grids.
        k2d = fused[:, :weights.nk_pad]
        v2d = fused[:, weights.nk_pad:]

    if weights.nk_pad != weights.nk:
        k2d = k2d[:, :weights.nk]
    if weights.nv_pad != weights.nv:
        v2d = v2d[:, :weights.nv]
    return k2d.reshape(*lead, weights.nk), v2d.reshape(*lead, weights.nv)


def init_params(key, hidden_size, num_heads, key_head_dim, value_head_dim,
                dtype=jnp.float32):
    """Deterministic init mimicking nn.Linear's default (uniform +/- 1/sqrt(in)).
    Weights are stored directly in [H, out] layout (== PyTorch weight.T)."""
    kk, kv = jax.random.split(key)
    bound = 1.0 / (hidden_size ** 0.5)
    w_key = jax.random.uniform(kk, (hidden_size, num_heads * key_head_dim),
                               dtype, minval=-bound, maxval=bound)
    w_value = jax.random.uniform(kv, (hidden_size, num_heads * value_head_dim),
                                 dtype, minval=-bound, maxval=bound)
    return w_key, w_value


if __name__ == "__main__":
    root = jax.random.PRNGKey(0)

    def _check(case_key, *, B, S, H, heads, kdim, vdim, dtype, budget, atol, rtol):
        kx, kw = jax.random.split(case_key)
        x = jax.random.normal(kx, (B, S, H), jnp.float32).astype(dtype)
        w_key, w_value = init_params(kw, H, heads, kdim, vdim, jnp.float32)
        # One-time fusion (hoisted out of the forward path).
        fused = fuse_kv_weights(w_key, w_value, dtype=dtype)
        k, v = linear_key_value(x, fused, vmem_budget_bytes=budget)
        jax.block_until_ready((k, v))
        assert k.shape == (B, S, heads * kdim)
        assert v.shape == (B, S, heads * vdim)
        xf = x.astype(jnp.float32)
        k_ref = xf @ w_key.astype(dtype).astype(jnp.float32)
        v_ref = xf @ w_value.astype(dtype).astype(jnp.float32)
        assert jnp.allclose(k.astype(jnp.float32), k_ref, atol=atol, rtol=rtol), "k mismatch"
        assert jnp.allclose(v.astype(jnp.float32), v_ref, atol=atol, rtol=rtol), "v mismatch"

    keys = jax.random.split(root, 4)

    # 1) Small module-sized shapes, f32, resident-weight fast path.
    _check(keys[0], B=2, S=8, H=32, heads=4, kdim=16, vdim=16,
           dtype=jnp.float32, budget=None, atol=2e-2, rtol=2e-2)
    # 2) Same shapes on the bf16 MXU path (looser tolerances).
    _check(keys[1], B=2, S=8, H=32, heads=4, kdim=16, vdim=16,
           dtype=jnp.bfloat16, budget=None, atol=6e-2, rtol=6e-2)
    # 3) Tiny VMEM budget forces the column-tiled (streamed-weight) plan.
    _check(keys[2], B=2, S=64, H=128, heads=8, kdim=128, vdim=128,
           dtype=jnp.float32, budget=600 * 1024, atol=2e-2, rtol=2e-2)
    # 4) Even tinier budget forces the K-tiled (accumulator) fallback plan.
    _check(keys[3], B=2, S=30, H=512, heads=1, kdim=128, vdim=128,
           dtype=jnp.float32, budget=320 * 1024, atol=2e-2, rtol=2e-2)

    print("KERNEL_OK")
</pallas_src>

<mosaic_0001>
module attributes {stable_mosaic.version = 11 : i64} {
  func.func @_kv_resident_kernel(%arg0: i32, %arg1: memref<16x32xf32, #tpu.memory_space<vmem>>, %arg2: memref<32x256xf32, #tpu.memory_space<vmem>>, %arg3: memref<16x128xf32, #tpu.memory_space<vmem>>, %arg4: memref<16x128xf32, #tpu.memory_space<vmem>>) attributes {dimension_semantics = [#tpu.dimension_semantics<parallel>], iteration_bounds = array<i64: 1>, scalar_prefetch = 0 : i64, scratch_operands = 0 : i64, tpu.core_type = #tpu.core_type<tc>, window_params = [{transform_indices = @transform_0, window_bounds = array<i64: 16, 32>}, {pipeline_mode = #tpu.pipeline_mode<synchronous>, transform_indices = @transform_1, window_bounds = array<i64: 32, 256>}, {transform_indices = @transform_2, window_bounds = array<i64: 16, 128>}, {transform_indices = @transform_3, window_bounds = array<i64: 16, 128>}]} {
    %c0 = arith.constant 0 : index
    %c0_0 = arith.constant 0 : index
    %0 = vector.load %arg1[%c0, %c0_0] : memref<16x32xf32, #tpu.memory_space<vmem>>, vector<16x32xf32>
    %c0_1 = arith.constant 0 : index
    %c0_2 = arith.constant 0 : index
    %1 = vector.load %arg2[%c0_1, %c0_2] : memref<32x256xf32, #tpu.memory_space<vmem>>, vector<32x128xf32>
    %cst = arith.constant dense<0.000000e+00> : vector<16x128xf32>
    %2 = tpu.matmul %0, %1, %cst {dimension_numbers = #tpu.dot_dimension_numbers<[1], [0], [0], [1], [0, 0, 1, 1], [], []>} : vector<16x32xf32>, vector<32x128xf32>, vector<16x128xf32> -> vector<16x128xf32>
    %c0_3 = arith.constant 0 : index
    %c0_4 = arith.constant 0 : index
    %3 = vector.load %arg3[%c0_3, %c0_4] : memref<16x128xf32, #tpu.memory_space<vmem>>, vector<16x128xf32>
    tpu.vector_store %arg3[%c0_3, %c0_4], %2 {strides = array<i32>} : memref<16x128xf32, #tpu.memory_space<vmem>>, vector<16x128xf32>,
    %c0_5 = arith.constant 0 : index
    %c128 = arith.constant 128 : index
    %4 = vector.load %arg2[%c0_5, %c128] : memref<32x256xf32, #tpu.memory_space<vmem>>, vector<32x128xf32>
    %cst_6 = arith.constant dense<0.000000e+00> : vector<16x128xf32>
    %5 = tpu.matmul %0, %4, %cst_6 {dimension_numbers = #tpu.dot_dimension_numbers<[1], [0], [0], [1], [0, 0, 1, 1], [], []>} : vector<16x32xf32>, vector<32x128xf32>, vector<16x128xf32> -> vector<16x128xf32>
    %c0_7 = arith.constant 0 : index
    %c0_8 = arith.constant 0 : index
    %6 = vector.load %arg4[%c0_7, %c0_8] : memref<16x128xf32, #tpu.memory_space<vmem>>, vector<16x128xf32>
    tpu.vector_store %arg4[%c0_7, %c0_8], %5 {strides = array<i32>} : memref<16x128xf32, #tpu.memory_space<vmem>>, vector<16x128xf32>,
    return
  }
  func.func @transform_0(%arg0: i32) -> (i32, i32) {
    %c0_i32 = arith.constant 0 : i32
    %c0_i32_0 = arith.constant 0 : i32
    return %arg0, %c0_i32 : i32, i32
  }
  func.func @transform_1(%arg0: i32) -> (i32, i32) {
    %c0_i32 = arith.constant 0 : i32
    %c0_i32_0 = arith.constant 0 : i32
    %c0_i32_1 = arith.constant 0 : i32
    return %c0_i32, %c0_i32_0 : i32, i32
  }
  func.func @transform_2(%arg0: i32) -> (i32, i32) {
    %c0_i32 = arith.constant 0 : i32
    %c0_i32_0 = arith.constant 0 : i32
    return %arg0, %c0_i32 : i32, i32
  }
  func.func @transform_3(%arg0: i32) -> (i32, i32) {
    %c0_i32 = arith.constant 0 : i32
    %c0_i32_0 = arith.constant 0 : i32
    return %arg0, %c0_i32 : i32, i32
  }
}

</mosaic_0001>

<bundles_post_ra>
// kernel: tpu_custom_call.1
= control target key start
LH: loop header
LB: loop body
LE: loop exit
PB: predicated region body
PF: predicated region fallthrough
CT: control target
= control target key end

     0   :  { %9 = vsyncpa [#allocation3], 0  ;;  %s431_s0 = inlined_call_operand.hbm [shape: f32[16,32], index: 0, kind: input, shape index: {}]   ;;  %s432_s1 = inlined_call_operand.hbm [shape: f32[32,256], index: 1, kind: input, shape index: {}]   ;;  %s433_s2 = inlined_call_operand.hbm [shape: f32[16,128], index: 2, kind: output, shape index: {0}]   ;;  %s434_s3 = inlined_call_operand.hbm [shape: f32[16,128], index: 3, kind: output, shape index: {1}]  }
   0x1   :  { %10 = vsyncpa [#allocation6], 0 }
   0x2   :  { %11 = vsyncpa [#allocation4], 0 }
   0x3   :  { %12 = vsyncpa [#allocation9], 0  ;;  %s382_s12 = smov [#allocation2]  }
   0x4   :  { %s18_s13 = sshll.u32 %s382_s12, 4  ;;  %s19_s13 = int_to_ptr.vmem [resolvable:$true] %s18_s13 }
   0x5   :  { %s302_s14 = scalar_lea.vmem %s19_s13, 256  ;;  %p307_p1 = scmp.lt.s32.totalorder %s19_s13, %s19_s13 }
   0x6   :  { %p303_p0 = scmp.ne.s32.totalorder %s19_s13, %s302_s14  ;;  %p308_p2 = scmp.lt.s32.totalorder %s302_s14, %s302_s14 }
   0x8   :  { %p309_p3 = por %p308_p2, %p307_p1 }
   0xa   :  { %p310_p4 = pnand %p309_p3, %p303_p0 }
   0xc   :  { %313 = shalt.err (!%p310_p4)
}
   0xd   :  { %s383_s15 = smov 128   ;;  %s384_s16 = smov 8  }
   0xe   :  { %24 = dma.hbm_to_vmem [thread:$0]  %s431_s0, 256, %s19_s13, [#allocation3], %s383_s15, %s383_s15, %s384_s16  }
   0xf   :  { %s385_s19 = smov [#allocation5]  }
  0x10   :  { %s30_s20 = sshll.u32 %s385_s19, 4  ;;  %s31_s20 = int_to_ptr.vmem [resolvable:$true] %s30_s20 }
  0x11   :  { %s322_s21 = scalar_lea.vmem %s31_s20, 1024  ;;  %p327_p6 = scmp.lt.s32.totalorder %s31_s20, %s31_s20 }
  0x12   :  { %p323_p5 = scmp.ne.s32.totalorder %s31_s20, %s322_s21  ;;  %p328_p7 = scmp.lt.s32.totalorder %s322_s21, %s322_s21 }
  0x14   :  { %p329_p8 = por %p328_p7, %p327_p6 }
  0x16   :  { %p330_p9 = pnand %p329_p8, %p323_p5 }
  0x18   :  { %333 = shalt.err (!%p330_p9)
}
  0x19   :  { %s386_s22 = smov 256   ;;  %s387_s23 = smov 16  }
  0x1a   :  { %36 = dma.hbm_to_vmem [thread:$0]  %s432_s1, 1024, %s31_s20, [#allocation6], %s386_s22, %s386_s22, %s387_s23  }
  0x1b   :  { %374 = dma.done.wait [#allocation3], 256  }
  0x1c   :  { %375 = vsyncadd [#allocation3], 4294967040 }
  0x1d   :  { %376 = dma.done.wait [#allocation6], 1024  }
  0x1e   :  { %377 = vsyncadd [#allocation6], 4294966272  ;;  %v48_v0 = vld [vmem:[#allocation5 + $0x30] sm:$0xff]  ;;  %v136_v1 = vld [vmem:[#allocation5 + $0x38] sm:$0xff]  ;;  %vm49_vm0 = vcmask 261120   ;;  %s388_s0 = smov [#allocation7]  }
  0x1f   :  { %v47_v2 = vld [vmem:[#allocation5 + $0x20] sm:$0xff]  ;;  %264 = vmatprep.subr.mxu0 %v48_v0  ;;  %275 = vmatprep.subr.mxu1 %v136_v1  ;;  %v135_v3 = vld [vmem:[#allocation5 + $0x28] sm:$0xff]  ;;  %v46_v4 = vld [vmem:[#allocation5 + $0x10] sm:$0xff]  ;;  %s219_s1 = sshll.u32 %s388_s0, 4  ;;  %s389_s26 = smov [#allocation8]   ;;  %s220_s1 = int_to_ptr.vmem [resolvable:$true] %s219_s1 }
  0x20   :  { %265 = vmatpush3.msra.mxu0 %v48_v0  ;;  %276 = vmatpush3.msra.mxu1 %v136_v1  ;;  %v134_v5 = vld [vmem:[#allocation5 + $0x18] sm:$0xff]  ;;  %v45_v6 = vld [vmem:[#allocation5] sm:$0xff]  ;;  %v133_v7 = vld [vmem:[#allocation5 + $0x8] sm:$0xff]  ;;  %s231_s27 = sshll.u32 %s389_s26, 4  ;;  %s334_s28 = scalar_lea.vmem %s220_s1, 256  ;;  %s232_s27 = int_to_ptr.vmem [resolvable:$true] %s231_s27 }
  0x21   :  { %266 = vmatprep.subr.mxu0 %v47_v2  ;;  %277 = vmatprep.subr.mxu1 %v135_v3  ;;  %v43_v8 = vld [vmem:[#allocation2] sm:$0xff]  ;;  %v44_v9 = vld [vmem:[#allocation2 + $0x8] sm:$0xff]  ;;  %p335_p10 = scmp.ne.s32.totalorder %s220_s1, %s334_s28  ;;  %p339_p11 = scmp.lt.s32.totalorder %s220_s1, %s220_s1 }
  0x22   :  { %267 = vmatpush3.msra.mxu0 %v47_v2  ;;  %278 = vmatpush3.msra.mxu1 %v135_v3  ;;  %p340_p12 = scmp.lt.s32.totalorder %s334_s28, %s334_s28 }
  0x23   :  { %268 = vmatprep.subr.mxu0 %v46_v4  ;;  %279 = vmatprep.subr.mxu1 %v134_v5 }
  0x24   :  { %269 = vmatpush3.msra.mxu0 %v46_v4  ;;  %280 = vmatpush3.msra.mxu1 %v134_v5  ;;  %p341_p13 = por %p340_p12, %p339_p11 }
  0x25   :  { %270 = vmatprep.subr.mxu0 %v45_v6  ;;  %281 = vmatprep.subr.mxu1 %v133_v7 }
  0x26   :  { %271 = vmatpush3.msra.mxu0 %v45_v6  ;;  %272 = vmatprep.mubr.msk.f32.mxu0 %vm49_vm0, %v43_v8  ;;  %p342_p0 = pnand %p341_p13, %p335_p10 }
  0x27   :  { %282 = vmatpush3.msra.mxu1 %v133_v7  ;;  %283 = vmatprep.mubr.msk.f32.mxu1 %vm49_vm0, %v43_v8 }
  0x28   :  { %273 = vmatmul.mubr.msk.f32.vlgmr.msra.gmra.mxu0 %vm49_vm0, %v44_v9  ;;  %284 = vmatmul.mubr.msk.f32.vlgmr.msra.gmra.mxu1 %vm49_vm0, %v44_v9 }
  0xe8   :  { %v274_v10 = vpop.f32.mrf.mxu0  ;;  %v285_v11 = vpop.f32.mrf.mxu1 }
  0xe9   :  { %132 = vst [vmem:[#allocation7 + $0x8] sm:$0xff] %v274_v10  ;;  %213 = vst [vmem:[#allocation8 + $0x8] sm:$0xff] %v285_v11 }
  0xea   :  { %v122_v12 = vpop.f32.mrf.mxu0  ;;  %v203_v13 = vpop.f32.mrf.mxu1 }
  0xeb   :  { %131 = vst [vmem:[#allocation7] sm:$0xff] %v122_v12  ;;  %212 = vst [vmem:[#allocation8] sm:$0xff] %v203_v13 }
  0xec   :  { %345 = shalt.err (!%p342_p0)
}
  0xed   :  { %225 = dma.vmem_to_hbm [thread:$0]  %s220_s1, 256, %s433_s2, [#allocation4], %s383_s15, %s383_s15, %s384_s16  }
  0xee   :  { %s354_s4 = scalar_lea.vmem %s232_s27, 256  ;;  %p359_p2 = scmp.lt.s32.totalorder %s232_s27, %s232_s27 }
  0xef   :  { %p355_p1 = scmp.ne.s32.totalorder %s232_s27, %s354_s4  ;;  %p360_p3 = scmp.lt.s32.totalorder %s354_s4, %s354_s4 }
  0xf1   :  { %p361_p4 = por %p360_p3, %p359_p2 }
  0xf3   :  { %p362_p5 = pnand %p361_p4, %p355_p1 }
  0xf5   :  { %365 = shalt.err (!%p362_p5)
}
  0xf6   :  { %237 = dma.vmem_to_hbm [thread:$0]  %s232_s27, 256, %s434_s3, [#allocation9], %s383_s15, %s383_s15, %s384_s16  }
  0xf7   :  { %378 = dma.done.wait [#allocation4], 256  }
  0xf8   :  { %379 = vsyncadd [#allocation4], 4294967040 }
  0xf9   :  { %380 = dma.done.wait [#allocation9], 256  }
  0xfa   :  { %381 = vsyncadd [#allocation9], 4294967040 }
  0xfb   :  { %244 = vsyncpa [#allocation3], 1 }
  0xfc   :  { %245 = vsyncpa [#allocation6], 1 }
  0xfd   :  { %246 = vsyncpa [#allocation4], 1 }
  0xfe   :  { %247 = vsyncpa [#allocation9], 1 }

</bundles_post_ra>
